<compile_context>
chip_gen: v7x
topology: tpu7x:2x2x1
jax: 0.10.0
libtpu: 0.0.40
codegen_flags: <defaults>
</compile_context>

<pallas_src>
import functools
import math

import numpy as np
import jax
import jax.numpy as jnp
from jax.experimental import pallas as pl
from jax.experimental.pallas import tpu as pltpu


def _pe_kernel(x_ref, div_ref, out_ref, *, d: int, k: int):
    # x_ref:   (TB, k*d)    folded input tile
    # div_ref: (1,  k*d)    f32 div_term tiled k times (broadcast over sublanes)
    # out_ref: (TB, 2*k*d)  interleaved [sin_0|cos_0|sin_1|cos_1|...] tile
    scaled = x_ref[...].astype(jnp.float32) * div_ref[...]     # f32 on VPU
    sin_v = jnp.sin(scaled)                                     # EUP
    cos_v = jnp.cos(scaled)
    # Static unroll over the k folded rows; each (sin, cos) chunk lands at its
    # final lane offset so the row-major reshape in the wrapper is a no-op.
    for j in range(k):
        src = slice(j * d, (j + 1) * d)
        lo = 2 * j * d
        out_ref[:, lo:lo + d] = sin_v[:, src].astype(out_ref.dtype)
        out_ref[:, lo + d:lo + 2 * d] = cos_v[:, src].astype(out_ref.dtype)


def _choose_fold(D: int) -> int:
    """Rows folded into the lane axis so the folded feature dim is lane-dense."""
    if D % 128 == 0:
        return 1
    need = 128 // math.gcd(D, 128)
    # Cap the static unroll of the in-kernel interleave; very awkward D
    # (odd / 2 mod 4) falls back to an unfolded, masked-store path.
    return need if need <= 32 else 1


def _choose_batch_tile(Bf: int, Df: int, itemsize: int) -> int:
    # Sublane packing: f32 -> 8 rows, bf16 -> 16, int8/fp8 -> 32.
    sub = 8 * max(1, 4 // max(itemsize, 1))
    budget_bytes = 16 << 20                       # double-buffered working set
    per_row = 6 * Df * itemsize + 10 * Df * 4     # 2x(in+out) DMA bufs + f32 temps
    tb = max(sub, budget_bytes // max(per_row, 1))
    tb = min(tb, 4096)
    if tb >= Bf:
        tb = Bf
        # Keep >= 2 grid steps so the "parallel" axis can shard across v7x's
        # two TensorCores when there is enough work to split.
        if Bf >= 2 * sub:
            half = ((Bf + 1) // 2 + sub - 1) // sub * sub
            if half < Bf:
                tb = half
    else:
        tb = max(sub, (tb // sub) * sub)
    return tb


def periodic_embedding(x: jax.Array) -> jax.Array:
    """x: (..., D) -> (..., 2D) = [sin(x*div_term), cos(x*div_term)]."""
    orig_shape = x.shape
    D = orig_shape[-1]
    B = int(np.prod(orig_shape[:-1])) if len(orig_shape) > 1 else 1
    x2d = x.reshape(B, D)

    # Fold k rows into the lane axis (pad B if needed) so blocks are lane-dense.
    k = _choose_fold(D)
    B_pad = ((B + k - 1) // k) * k
    if B_pad != B:
        x2d = jnp.concatenate(
            [x2d, jnp.zeros((B_pad - B, D), dtype=x2d.dtype)], axis=0)
    Bf, Df = B_pad // k, k * D
    xf = x2d.reshape(Bf, Df)

    # div_term built in float32 and tiled across the folded lane axis.
    div_base = jnp.exp(
        jnp.arange(D, dtype=jnp.float32) * (-(math.log(10000.0) / D)))
    div_f = jnp.tile(div_base, (k,)).reshape(1, Df)

    itemsize = jnp.dtype(x.dtype).itemsize
    TB = _choose_batch_tile(Bf, Df, itemsize)
    grid = (pl.cdiv(Bf, TB),)

    cost = pl.CostEstimate(
        flops=Bf * Df,                          # the x * div multiply
        transcendentals=2 * Bf * Df,            # sin + cos
        bytes_accessed=3 * Bf * Df * itemsize,  # 1x read + 2x write
    )

    out_f = pl.pallas_call(
        functools.partial(_pe_kernel, d=D, k=k),
        out_shape=jax.ShapeDtypeStruct((Bf, 2 * Df), x.dtype),
        grid_spec=pltpu.PrefetchScalarGridSpec(
            num_scalar_prefetch=0,
            grid=grid,
            in_specs=[
                pl.BlockSpec((TB, Df), lambda i: (i, 0)),   # x tile
                pl.BlockSpec((1, Df), lambda i: (0, 0)),    # div (fetched once)
            ],
            out_specs=pl.BlockSpec((TB, 2 * Df), lambda i: (i, 0)),
        ),
        compiler_params=pltpu.CompilerParams(
            dimension_semantics=("parallel",),              # megacore-shardable
            vmem_limit_bytes=32 << 20,
        ),
        cost_estimate=cost,
    )(xf, div_f)

    # Row-major reshape of the folded output is already [sin | cos] per row.
    out = out_f.reshape(B_pad, 2 * D)
    if B_pad != B:
        out = out[:B]
    return out.reshape(*orig_shape[:-1], 2 * D)


def _reference(x: jax.Array) -> jax.Array:
    D = x.shape[-1]
    div_term = jnp.exp(
        jnp.arange(0, D, dtype=jnp.float32) * (-(math.log(10000.0) / D)))
    return jnp.concatenate([jnp.sin(x * div_term), jnp.cos(x * div_term)], axis=-1)


if __name__ == "__main__":
    key = jax.random.PRNGKey(0)
    batch, input_dim = 32, 16
    x = jax.random.normal(key, (batch, input_dim), dtype=jnp.float32)

    pe = periodic_embedding(x)
    jax.block_until_ready(pe)
    np.testing.assert_allclose(np.asarray(pe), np.asarray(_reference(x)),
                               rtol=1e-5, atol=1e-5)
    assert pe.shape == (batch, 2 * input_dim)

    # Path coverage: lane-aligned D (no fold), fold + batch padding,
    # and the unfoldable-D fallback (masked stores).
    for shape in [(4, 128), (5, 16), (3, 13)]:
        xi = jax.random.normal(jax.random.PRNGKey(1), shape, dtype=jnp.float32)
        yi = periodic_embedding(xi)
        jax.block_until_ready(yi)
        np.testing.assert_allclose(np.asarray(yi), np.asarray(_reference(xi)),
                                   rtol=1e-5, atol=1e-5)
        assert yi.shape == (shape[0], 2 * shape[1])

    print("KERNEL_OK")
</pallas_src>

<mosaic_0001>
module attributes {stable_mosaic.version = 11 : i64} {
  func.func @_pe_kernel(%arg0: i32, %arg1: memref<4x128xf32, #tpu.memory_space<vmem>>, %arg2: memref<1x128xf32, #tpu.memory_space<vmem>>, %arg3: memref<4x256xf32, #tpu.memory_space<vmem>>) attributes {dimension_semantics = [#tpu.dimension_semantics<parallel>], iteration_bounds = array<i64: 1>, scalar_prefetch = 0 : i64, scratch_operands = 0 : i64, tpu.core_type = #tpu.core_type<tc>, window_params = [{transform_indices = @transform_0, window_bounds = array<i64: 4, 128>}, {pipeline_mode = #tpu.pipeline_mode<synchronous>, transform_indices = @transform_1, window_bounds = array<i64: 1, 128>}, {transform_indices = @transform_2, window_bounds = array<i64: 4, 256>}]} {
    %c0 = arith.constant 0 : index
    %c0_0 = arith.constant 0 : index
    %0 = vector.load %arg1[%c0, %c0_0] : memref<4x128xf32, #tpu.memory_space<vmem>>, vector<4x128xf32>
    %c0_1 = arith.constant 0 : index
    %c0_2 = arith.constant 0 : index
    %1 = vector.load %arg2[%c0_1, %c0_2] : memref<1x128xf32, #tpu.memory_space<vmem>>, vector<1x128xf32>
    %2 = vector.broadcast %1 : vector<1x128xf32> to vector<4x128xf32>
    %3 = arith.mulf %0, %2 : vector<4x128xf32>
    %4 = math.sin %3 : vector<4x128xf32>
    %5 = math.cos %3 : vector<4x128xf32>
    %6 = vector.extract_strided_slice %4 {offsets = [0, 0], sizes = [4, 16], strides = [1, 1]} : vector<4x128xf32> to vector<4x16xf32>
    %c0_3 = arith.constant 0 : index
    %c0_4 = arith.constant 0 : index
    %7 = vector.load %arg3[%c0_3, %c0_4] : memref<4x256xf32, #tpu.memory_space<vmem>>, vector<4x16xf32>
    tpu.vector_store %arg3[%c0_3, %c0_4], %6 {strides = array<i32>} : memref<4x256xf32, #tpu.memory_space<vmem>>, vector<4x16xf32>,
    %8 = vector.extract_strided_slice %5 {offsets = [0, 0], sizes = [4, 16], strides = [1, 1]} : vector<4x128xf32> to vector<4x16xf32>
    %c0_5 = arith.constant 0 : index
    %c16 = arith.constant 16 : index
    %9 = vector.load %arg3[%c0_5, %c16] : memref<4x256xf32, #tpu.memory_space<vmem>>, vector<4x16xf32>
    tpu.vector_store %arg3[%c0_5, %c16], %8 {strides = array<i32>} : memref<4x256xf32, #tpu.memory_space<vmem>>, vector<4x16xf32>,
    %10 = vector.extract_strided_slice %4 {offsets = [0, 16], sizes = [4, 16], strides = [1, 1]} : vector<4x128xf32> to vector<4x16xf32>
    %c0_6 = arith.constant 0 : index
    %c32 = arith.constant 32 : index
    %11 = vector.load %arg3[%c0_6, %c32] : memref<4x256xf32, #tpu.memory_space<vmem>>, vector<4x16xf32>
    tpu.vector_store %arg3[%c0_6, %c32], %10 {strides = array<i32>} : memref<4x256xf32, #tpu.memory_space<vmem>>, vector<4x16xf32>,
    %12 = vector.extract_strided_slice %5 {offsets = [0, 16], sizes = [4, 16], strides = [1, 1]} : vector<4x128xf32> to vector<4x16xf32>
    %c0_7 = arith.constant 0 : index
    %c48 = arith.constant 48 : index
    %13 = vector.load %arg3[%c0_7, %c48] : memref<4x256xf32, #tpu.memory_space<vmem>>, vector<4x16xf32>
    tpu.vector_store %arg3[%c0_7, %c48], %12 {strides = array<i32>} : memref<4x256xf32, #tpu.memory_space<vmem>>, vector<4x16xf32>,
    %14 = vector.extract_strided_slice %4 {offsets = [0, 32], sizes = [4, 16], strides = [1, 1]} : vector<4x128xf32> to vector<4x16xf32>
    %c0_8 = arith.constant 0 : index
    %c64 = arith.constant 64 : index
    %15 = vector.load %arg3[%c0_8, %c64] : memref<4x256xf32, #tpu.memory_space<vmem>>, vector<4x16xf32>
    tpu.vector_store %arg3[%c0_8, %c64], %14 {strides = array<i32>} : memref<4x256xf32, #tpu.memory_space<vmem>>, vector<4x16xf32>,
    %16 = vector.extract_strided_slice %5 {offsets = [0, 32], sizes = [4, 16], strides = [1, 1]} : vector<4x128xf32> to vector<4x16xf32>
    %c0_9 = arith.constant 0 : index
    %c80 = arith.constant 80 : index
    %17 = vector.load %arg3[%c0_9, %c80] : memref<4x256xf32, #tpu.memory_space<vmem>>, vector<4x16xf32>
    tpu.vector_store %arg3[%c0_9, %c80], %16 {strides = array<i32>} : memref<4x256xf32, #tpu.memory_space<vmem>>, vector<4x16xf32>,
    %18 = vector.extract_strided_slice %4 {offsets = [0, 48], sizes = [4, 16], strides = [1, 1]} : vector<4x128xf32> to vector<4x16xf32>
    %c0_10 = arith.constant 0 : index
    %c96 = arith.constant 96 : index
    %19 = vector.load %arg3[%c0_10, %c96] : memref<4x256xf32, #tpu.memory_space<vmem>>, vector<4x16xf32>
    tpu.vector_store %arg3[%c0_10, %c96], %18 {strides = array<i32>} : memref<4x256xf32, #tpu.memory_space<vmem>>, vector<4x16xf32>,
    %20 = vector.extract_strided_slice %5 {offsets = [0, 48], sizes = [4, 16], strides = [1, 1]} : vector<4x128xf32> to vector<4x16xf32>
    %c0_11 = arith.constant 0 : index
    %c112 = arith.constant 112 : index
    %21 = vector.load %arg3[%c0_11, %c112] : memref<4x256xf32, #tpu.memory_space<vmem>>, vector<4x16xf32>
    tpu.vector_store %arg3[%c0_11, %c112], %20 {strides = array<i32>} : memref<4x256xf32, #tpu.memory_space<vmem>>, vector<4x16xf32>,
    %22 = vector.extract_strided_slice %4 {offsets = [0, 64], sizes = [4, 16], strides = [1, 1]} : vector<4x128xf32> to vector<4x16xf32>
    %c0_12 = arith.constant 0 : index
    %c128 = arith.constant 128 : index
    %23 = vector.load %arg3[%c0_12, %c128] : memref<4x256xf32, #tpu.memory_space<vmem>>, vector<4x16xf32>
    tpu.vector_store %arg3[%c0_12, %c128], %22 {strides = array<i32>} : memref<4x256xf32, #tpu.memory_space<vmem>>, vector<4x16xf32>,
    %24 = vector.extract_strided_slice %5 {offsets = [0, 64], sizes = [4, 16], strides = [1, 1]} : vector<4x128xf32> to vector<4x16xf32>
    %c0_13 = arith.constant 0 : index
    %c144 = arith.constant 144 : index
    %25 = vector.load %arg3[%c0_13, %c144] : memref<4x256xf32, #tpu.memory_space<vmem>>, vector<4x16xf32>
    tpu.vector_store %arg3[%c0_13, %c144], %24 {strides = array<i32>} : memref<4x256xf32, #tpu.memory_space<vmem>>, vector<4x16xf32>,
    %26 = vector.extract_strided_slice %4 {offsets = [0, 80], sizes = [4, 16], strides = [1, 1]} : vector<4x128xf32> to vector<4x16xf32>
    %c0_14 = arith.constant 0 : index
    %c160 = arith.constant 160 : index
    %27 = vector.load %arg3[%c0_14, %c160] : memref<4x256xf32, #tpu.memory_space<vmem>>, vector<4x16xf32>
    tpu.vector_store %arg3[%c0_14, %c160], %26 {strides = array<i32>} : memref<4x256xf32, #tpu.memory_space<vmem>>, vector<4x16xf32>,
    %28 = vector.extract_strided_slice %5 {offsets = [0, 80], sizes = [4, 16], strides = [1, 1]} : vector<4x128xf32> to vector<4x16xf32>
    %c0_15 = arith.constant 0 : index
    %c176 = arith.constant 176 : index
    %29 = vector.load %arg3[%c0_15, %c176] : memref<4x256xf32, #tpu.memory_space<vmem>>, vector<4x16xf32>
    tpu.vector_store %arg3[%c0_15, %c176], %28 {strides = array<i32>} : memref<4x256xf32, #tpu.memory_space<vmem>>, vector<4x16xf32>,
    %30 = vector.extract_strided_slice %4 {offsets = [0, 96], sizes = [4, 16], strides = [1, 1]} : vector<4x128xf32> to vector<4x16xf32>
    %c0_16 = arith.constant 0 : index
    %c192 = arith.constant 192 : index
    %31 = vector.load %arg3[%c0_16, %c192] : memref<4x256xf32, #tpu.memory_space<vmem>>, vector<4x16xf32>
    tpu.vector_store %arg3[%c0_16, %c192], %30 {strides = array<i32>} : memref<4x256xf32, #tpu.memory_space<vmem>>, vector<4x16xf32>,
    %32 = vector.extract_strided_slice %5 {offsets = [0, 96], sizes = [4, 16], strides = [1, 1]} : vector<4x128xf32> to vector<4x16xf32>
    %c0_17 = arith.constant 0 : index
    %c208 = arith.constant 208 : index
    %33 = vector.load %arg3[%c0_17, %c208] : memref<4x256xf32, #tpu.memory_space<vmem>>, vector<4x16xf32>
    tpu.vector_store %arg3[%c0_17, %c208], %32 {strides = array<i32>} : memref<4x256xf32, #tpu.memory_space<vmem>>, vector<4x16xf32>,
    %34 = vector.extract_strided_slice %4 {offsets = [0, 112], sizes = [4, 16], strides = [1, 1]} : vector<4x128xf32> to vector<4x16xf32>
    %c0_18 = arith.constant 0 : index
    %c224 = arith.constant 224 : index
    %35 = vector.load %arg3[%c0_18, %c224] : memref<4x256xf32, #tpu.memory_space<vmem>>, vector<4x16xf32>
    tpu.vector_store %arg3[%c0_18, %c224], %34 {strides = array<i32>} : memref<4x256xf32, #tpu.memory_space<vmem>>, vector<4x16xf32>,
    %36 = vector.extract_strided_slice %5 {offsets = [0, 112], sizes = [4, 16], strides = [1, 1]} : vector<4x128xf32> to vector<4x16xf32>
    %c0_19 = arith.constant 0 : index
    %c240 = arith.constant 240 : index
    %37 = vector.load %arg3[%c0_19, %c240] : memref<4x256xf32, #tpu.memory_space<vmem>>, vector<4x16xf32>
    tpu.vector_store %arg3[%c0_19, %c240], %36 {strides = array<i32>} : memref<4x256xf32, #tpu.memory_space<vmem>>, vector<4x16xf32>,
    return
  }
  func.func @transform_0(%arg0: i32) -> (i32, i32) {
    %c0_i32 = arith.constant 0 : i32
    %c0_i32_0 = arith.constant 0 : i32
    return %arg0, %c0_i32 : i32, i32
  }
  func.func @transform_1(%arg0: i32) -> (i32, i32) {
    %c0_i32 = arith.constant 0 : i32
    %c0_i32_0 = arith.constant 0 : i32
    %c0_i32_1 = arith.constant 0 : i32
    return %c0_i32, %c0_i32_0 : i32, i32
  }
  func.func @transform_2(%arg0: i32) -> (i32, i32) {
    %c0_i32 = arith.constant 0 : i32
    %c0_i32_0 = arith.constant 0 : i32
    return %arg0, %c0_i32 : i32, i32
  }
}

</mosaic_0001>

<bundles_post_ra>
// kernel: tpu_custom_call.1
= control target key start
LH: loop header
LB: loop body
LE: loop exit
PB: predicated region body
PF: predicated region fallthrough
CT: control target
= control target key end

     0   :  { %7 = vsyncpa [#allocation3], 0  ;;  %s483_s0 = inlined_call_operand.hbm [shape: f32[4,128], index: 0, kind: input, shape index: {}]   ;;  %s484_s1 = inlined_call_operand.vmem [shape: f32[1,128], index: 1, kind: input, shape index: {}]   ;;  %s485_s2 = inlined_call_operand.hbm [shape: f32[4,256], index: 2, kind: output, shape index: {}]  }
   0x1   :  { %8 = vsyncpa [#allocation4], 0  ;;  %s403_s9 = smov [#allocation2]   ;;  %s355_s13 = scalar_lea.hbm %s483_s0, 64 }
   0x2   :  { %s15_s10 = sshll.u32 %s403_s9, 4  ;;  %p356_p0 = scmp.ne.s32.totalorder %s483_s0, %s355_s13  ;;  %s16_s10 = int_to_ptr.vmem [resolvable:$true] %s15_s10 }
   0x3   :  { %p359_p1 = scmp.lt.u32.totalorder %s355_s13, %s483_s0 }
   0x5   :  { %p361_p2 = pnand %p359_p1, %p356_p0 }
   0x7   :  { %364 = shalt.err (!%p361_p2)
}
   0x8   :  { %s365_s18 = scalar_lea.vmem %s16_s10, 64  ;;  %p370_p4 = scmp.lt.s32.totalorder %s16_s10, %s16_s10 }
   0x9   :  { %p366_p3 = scmp.ne.s32.totalorder %s16_s10, %s365_s18  ;;  %p371_p5 = scmp.lt.s32.totalorder %s365_s18, %s365_s18 }
   0xb   :  { %p372_p6 = por %p371_p5, %p370_p4 }
   0xd   :  { %p373_p7 = pnand %p372_p6, %p366_p3 }
   0xf   :  { %376 = shalt.err (!%p373_p7)
}
  0x10   :  { %18 = dma.hbm_to_vmem [thread:$0]  %s483_s0, 64, %s16_s10, [#allocation3]  }
  0x11   :  { %399 = dma.done.wait [#allocation3], 64  }
  0x12   :  { %400 = vsyncadd [#allocation3], 4294967232  ;;  %v24_v0 = vld [vmem:[#allocation2] sm:$0xf]  ;;  %v404_v14 = vmov 683565275  }
  0x13   :  { %v323_v1 = vld [vmem:[%s484_s1] ss:$0 sm:$0xff]  ;;  %v405_v16 = vmov 2475754826   ;;  %v406_v18 = vmov 2131351028  }
  0x14   :  { %v448_v2 = vmul.f32 %v323_v1, %v24_v0  ;;  %v407_v20 = vmov 2102212464   ;;  %v408_v22 = vmov 920167782   ;;  %v409_v29 = vmov 1326507024  }
  0x15   :  { %s410_s0 = smov 64   ;;  %s411_s1 = smov 80  }
  0x16   :  { %v36_v3 = vand.u32 2139095040, %v448_v2  ;;  %v33_v5 = vand.u32 2147483647, %v448_v2  ;;  %vm35_vm7 = vcmp.lt.s32.totalorder %v448_v2, 0  ;;  %vm125_vm15 = vweird.f32 %v448_v2  ;;  %s412_s23 = smov 16   ;;  %s413_s24 = smov 32  }
  0x17   :  { %s414_s25 = smov 96   ;;  %s415_s26 = smov 48  }
  0x18   :  { %v37_v4 = vshrl.u32 %v36_v3, 23  ;;  %v40_v8 = vand.u32 8388607, %v33_v5  ;;  %vm34_vm8 = vcmp.le.f32.partialorder %v33_v5, 0.7853982  ;;  %s416_s27 = smov 112  }
  0x19   :  { %s417_s28 = smov [#allocation5]  }
  0x1a   :  { %v324_v6 = vadd.s32 4294967169, %v37_v4  ;;  %v41_v11 = vor.u32 8388608, %v40_v8  ;;  %s314_s29 = sshll.u32 %s417_s28, 4  ;;  %s315_s29 = int_to_ptr.vmem [resolvable:$true] %s314_s29 }
  0x1b   :  { %s377_s30 = scalar_lea.vmem %s315_s29, 128  ;;  %p382_p9 = scmp.lt.s32.totalorder %s315_s29, %s315_s29 }
  0x1c   :  { %v43_v7 = vadd.s32 1, %v324_v6  ;;  %v81_v31 = vshll.u32 %v41_v11, 8  ;;  %p378_p8 = scmp.ne.s32.totalorder %s315_s29, %s377_s30  ;;  %p383_p10 = scmp.lt.s32.totalorder %s377_s30, %s377_s30 }
  0x1e   :  { %vm44_vm0 = vcmp.gt.s32.totalorder %v43_v7, 0  ;;  %p384_p11 = por %p383_p10, %p382_p9 }
  0x1f   :  { %v45_v9 = vsel %vm44_vm0, %v43_v7, 0  ;;  %vm240_vm0 = vcmask 125952  }
  0x20   :  { %v47_v10 = vand.u32 31, %v45_v9  ;;  %v46_v12 = vshrl.u32 %v45_v9, 5  ;;  %p385_p12 = pnand %p384_p11, %p378_p8 }
  0x22   :  { %v48_v13 = vsub.s32 32, %v47_v10  ;;  %v50_v15 = vshll.u32 %v404_v14, %v47_v10  ;;  %v53_v17 = vshll.u32 %v405_v16, %v47_v10  ;;  %v56_v19 = vshll.u32 %v406_v18, %v47_v10 }
  0x23   :  { %v59_v21 = vshll.u32 %v407_v20, %v47_v10  ;;  %v62_v23 = vshll.u32 %v408_v22, %v47_v10  ;;  %vm65_vm1 = vcmp.lt.s32.totalorder %v46_v12, 1  ;;  %vm68_vm2 = vcmp.lt.s32.totalorder %v46_v12, 4 }
  0x24   :  { %v49_v24 = vshrl.u32 %v404_v14, %v48_v13  ;;  %v51_v25 = vshrl.u32 %v405_v16, %v48_v13  ;;  %v54_v26 = vshrl.u32 %v406_v18, %v48_v13  ;;  %v57_v27 = vshrl.u32 %v407_v20, %v48_v13 }
  0x25   :  { %v60_v28 = vshrl.u32 %v408_v22, %v48_v13  ;;  %v63_v30 = vshrl.u32 %v409_v29, %v48_v13  ;;  %vm66_vm3 = vcmp.lt.s32.totalorder %v46_v12, 2  ;;  %vm67_vm4 = vcmp.lt.s32.totalorder %v46_v12, 3 }
  0x26   :  { %v52_v32 = vor.u32 %v51_v25, %v50_v15  ;;  %v55_v33 = vor.u32 %v54_v26, %v53_v17  ;;  %v58_v34 = vor.u32 %v57_v27, %v56_v19 }
  0x27   :  { %v61_v35 = vor.u32 %v60_v28, %v59_v21  ;;  %v64_v36 = vor.u32 %v63_v30, %v62_v23 }
  0x28   :  { %v69_v37 = vsel %vm65_vm1, %v49_v24, %v52_v32  ;;  %v70_v38 = vsel %vm68_vm2, %v58_v34, 2102212464  ;;  %v73_v39 = vsel %vm65_vm1, %v52_v32, %v55_v33  ;;  %v77_v40 = vsel %vm65_vm1, %v55_v33, %v58_v34 }
  0x29   :  { %v71_v41 = vsel %vm67_vm4, %v55_v33, %v70_v38  ;;  %v74_v42 = vsel %vm68_vm2, %v61_v35, 920167782  ;;  %v78_v43 = vsel %vm68_vm2, %v64_v36, 1326507024  ;;  %vm246_vm1 = vcmask 257152  }
  0x2a   :  { %v75_v44 = vsel %vm67_vm4, %v58_v34, %v74_v42  ;;  %v79_v45 = vsel %vm67_vm4, %v61_v35, %v78_v43  ;;  %v72_v46 = vsel %vm66_vm3, %v69_v37, %v71_v41  ;;  %vm252_vm2 = vcmask 388352  }
  0x2b   :  { %v76_v47 = vsel %vm66_vm3, %v73_v39, %v75_v44  ;;  %v80_v48 = vsel %vm66_vm3, %v77_v40, %v79_v45  ;;  %v88_v53 = vmul.u32 %v81_v31, %v72_v46  ;;  %vm257_vm3 = vcmask 519552  }
  0x2c   :  { %v454_v49 = vmul.u32.u64.low %v81_v31, %v80_v48  ;;  %v455_v50 = vmul.u32.u64.high %v81_v31, %v80_v48, %v454_v49  ;;  %v457_v51 = vmul.u32.u64.low %v81_v31, %v76_v47  ;;  %v458_v52 = vmul.u32.u64.high %v81_v31, %v76_v47, %v457_v51 }
  0x2d   :  { %vm262_vm4 = vcmask 650752  }
  0x2e   :  { %vm90_vm5 = vc.u32 %v455_v50, %v457_v51  ;;  %v91_v54 = vadd.s32 1, %v458_v52  ;;  %v89_v1 = vadd.s32 %v457_v51, %v455_v50 }
  0x30   :  { %v92_v55 = vsel %vm90_vm5, %v91_v54, %v458_v52  ;;  %vm267_vm5 = vcmask 781952  }
  0x31   :  { %v93_v56 = vadd.s32 %v92_v55, %v88_v53 }
  0x33   :  { %v94_v57 = vadd.s32 536870912, %v93_v56 }
  0x35   :  { %v95_v58 = vshrl.u32 %v94_v57, 30 }
  0x37   :  { %v96_v59 = vshll.u32 %v95_v58, 30  ;;  %v119_v15 = vsub.s32 4, %v95_v58 }
  0x39   :  { %v97_v60 = vsub.s32 %v93_v56, %v96_v59  ;;  %v120_v18 = vsel %vm35_vm7, %v119_v15, %v95_v58 }
  0x3a   :  { %v122_v21 = vsel %vm34_vm8, 0, %v120_v18 }
  0x3b   :  { %v99_v61 = vsub.s32 0, %v97_v60  ;;  %v126_v22 = vadd.s32 3, %v122_v21  ;;  %v230_v24 = vand.u32 3, %v122_v21 }
  0x3d   :  { %v325_v62 = vmin.u32 %v99_v61, %v97_v60  ;;  %v127_v23 = vand.u32 3, %v126_v22  ;;  %vm235_vm10 = vcmp.eq.s32.totalorder %v230_v24, 2  ;;  %vm232_vm12 = vcmp.eq.s32.totalorder %v230_v24, 0 }
  0x3e   :  { %vm231_vm14 = vcmp.lt.s32.totalorder %v230_v24, 2 }
  0x3f   :  { %v101_v63 = vclz %v325_v62  ;;  %vm132_vm9 = vcmp.eq.s32.totalorder %v127_v23, 2  ;;  %vm129_vm11 = vcmp.eq.s32.totalorder %v127_v23, 0  ;;  %vm128_vm13 = vcmp.lt.s32.totalorder %v127_v23, 2 }
  0x41   :  { %v326_v0 = vadd.s32 4294967294, %v101_v63 }
  0x43   :  { %vm327_vm6 = vcmp.lt.s32.totalorder %v326_v0, 0 }
  0x44   :  { %v104_v3 = vsel %vm327_vm6, 0, %v326_v0  ;;  %vm272_vm6 = vcmask 913152  }
  0x45   :  { %v105_v4 = vsub.s32 32, %v104_v3  ;;  %v106_v6 = vshll.u32 %v97_v60, %v104_v3  ;;  %v109_v7 = vsub.s32 4294967266, %v104_v3 }
  0x47   :  { %v107_v8 = vshrl.u32 %v89_v1, %v105_v4  ;;  %v110_v9 = vadd.s32 127, %v109_v7 }
  0x49   :  { %v108_v10 = vor.u32 %v107_v8, %v106_v6  ;;  %v111_v11 = vshll.u32 %v110_v9, 23 }
  0x4b   :  { %v112_v12 = vor.u32 4788187, %v111_v11  ;;  %v115_v13 = vcvt.s32.f32 %v108_v10 }
  0x4d   :  { %v113_v14 = vand.u32 2147483647, %v112_v12 }
  0x4f   :  { %v116_v16 = vmul.f32 %v115_v13, %v113_v14 }
  0x51   :  { %v117_v17 = vxor.u32 2147483648, %v116_v16 }
  0x53   :  { %v118_v19 = vsel %vm35_vm7, %v117_v17, %v116_v16  ;;  %vm277_vm7 = vcmask 1044352  }
  0x54   :  { %v121_v20 = vsel %vm34_vm8, %v448_v2, %v118_v19 }
  0x55   :  { %351 = vcosq.f32 %v121_v20 }
  0x56   :  { %353 = vsinq.f32 %v121_v20 }
  0x5f   :  { %v352_v25 = vpop.eup %351 }
  0x60   :  { %v354_v26 = vpop.eup %353  ;;  %v133_v27 = vxor.u32 2147483648, %v352_v25 }
  0x61   :  { %v130_v5 = vxor.u32 2147483648, %v354_v26 }
  0x62   :  { %v134_v28 = vsel %vm132_vm9, %v133_v27, %v354_v26  ;;  %v237_v29 = vsel %vm235_vm10, %v133_v27, %v354_v26 }
  0x63   :  { %v131_v30 = vsel %vm129_vm11, %v352_v25, %v130_v5  ;;  %v234_v31 = vsel %vm232_vm12, %v352_v25, %v130_v5 }
  0x64   :  { %v135_v32 = vsel %vm128_vm13, %v131_v30, %v134_v28  ;;  %v238_v33 = vsel %vm231_vm14, %v234_v31, %v237_v29 }
  0x65   :  { %v136_v34 = vsel %vm125_vm15, nan, %v135_v32  ;;  %v239_v35 = vsel %vm125_vm15, nan, %v238_v33 }
  0x66   :  { %279 = vrot.lane.b32.xlu0 %v136_v34, %s410_s0  ;;  %283 = vrot.lane.b32.xlu1 %v239_v35, %s411_s1  ;;  %241 = vst.msk [vmem:[#allocation5] sm:$0xf] %vm240_vm0, %v136_v34 }
  0x6a   :  { %243 = vrot.lane.b32.xlu0 %v239_v35, %s412_s23  ;;  %249 = vrot.lane.b32.xlu1 %v136_v34, %s412_s23 }
  0x6e   :  { %287 = vrot.lane.b32.xlu0 %v136_v34, %s411_s1  ;;  %254 = vrot.lane.b32.xlu1 %v239_v35, %s413_s24 }
  0x72   :  { %291 = vrot.lane.b32.xlu0 %v239_v35, %s414_s25  ;;  %259 = vrot.lane.b32.xlu1 %v136_v34, %s413_s24 }
  0x76   :  { %295 = vrot.lane.b32.xlu0 %v136_v34, %s414_s25  ;;  %264 = vrot.lane.b32.xlu1 %v239_v35, %s415_s26 }
  0x7a   :  { %299 = vrot.lane.b32.xlu0 %v239_v35, %s416_s27  ;;  %269 = vrot.lane.b32.xlu1 %v136_v34, %s415_s26 }
  0x7e   :  { %303 = vrot.lane.b32.xlu0 %v136_v34, %s416_s27  ;;  %274 = vrot.lane.b32.xlu1 %v239_v35, %s410_s0 }
  0xd8   :  { %v280_v2 = vpop.permute.xlu0 %279  ;;  %v284_v36 = vpop.permute.xlu1 %283 }
  0xd9   :  { %282 = vst.msk [vmem:[#allocation5 + $0x4] sm:$0xf] %vm240_vm0, %v280_v2 }
  0xda   :  { %286 = vst.msk [vmem:[#allocation5 + $0x4] sm:$0xf] %vm246_vm1, %v284_v36 }
  0xdc   :  { %v244_v37 = vpop.permute.xlu0 %243  ;;  %v250_v38 = vpop.permute.xlu1 %249 }
  0xdd   :  { %247 = vst.msk [vmem:[#allocation5] sm:$0xf] %vm246_vm1, %v244_v37 }
  0xde   :  { %253 = vst.msk [vmem:[#allocation5] sm:$0xf] %vm252_vm2, %v250_v38 }
  0xe0   :  { %v288_v39 = vpop.permute.xlu0 %287  ;;  %v255_v40 = vpop.permute.xlu1 %254 }
  0xe1   :  { %290 = vst.msk [vmem:[#allocation5 + $0x4] sm:$0xf] %vm252_vm2, %v288_v39 }
  0xe2   :  { %258 = vst.msk [vmem:[#allocation5] sm:$0xf] %vm257_vm3, %v255_v40 }
  0xe4   :  { %v292_v41 = vpop.permute.xlu0 %291  ;;  %v260_v42 = vpop.permute.xlu1 %259 }
  0xe5   :  { %294 = vst.msk [vmem:[#allocation5 + $0x4] sm:$0xf] %vm257_vm3, %v292_v41 }
  0xe6   :  { %263 = vst.msk [vmem:[#allocation5] sm:$0xf] %vm262_vm4, %v260_v42 }
  0xe8   :  { %v296_v43 = vpop.permute.xlu0 %295  ;;  %v265_v44 = vpop.permute.xlu1 %264 }
  0xe9   :  { %298 = vst.msk [vmem:[#allocation5 + $0x4] sm:$0xf] %vm262_vm4, %v296_v43 }
  0xea   :  { %268 = vst.msk [vmem:[#allocation5] sm:$0xf] %vm267_vm5, %v265_v44 }
  0xec   :  { %v300_v45 = vpop.permute.xlu0 %299  ;;  %v270_v46 = vpop.permute.xlu1 %269 }
  0xed   :  { %302 = vst.msk [vmem:[#allocation5 + $0x4] sm:$0xf] %vm267_vm5, %v300_v45 }
  0xee   :  { %273 = vst.msk [vmem:[#allocation5] sm:$0xf] %vm272_vm6, %v270_v46 }
  0xf0   :  { %v304_v47 = vpop.permute.xlu0 %303  ;;  %v275_v48 = vpop.permute.xlu1 %274 }
  0xf1   :  { %306 = vst.msk [vmem:[#allocation5 + $0x4] sm:$0xf] %vm272_vm6, %v304_v47 }
  0xf2   :  { %278 = vst.msk [vmem:[#allocation5] sm:$0xf] %vm277_vm7, %v275_v48  ;;  %307 = vst.msk [vmem:[#allocation5 + $0x4] sm:$0xf] %vm277_vm7, %v239_v35 }
  0xf3   :  { %388 = shalt.err (!%p385_p12)
}
  0xf4   :  { %s389_s5 = scalar_lea.hbm %s485_s2, 128 }
  0xf5   :  { %p390_p13 = scmp.ne.s32.totalorder %s485_s2, %s389_s5  ;;  %p393_p0 = scmp.lt.u32.totalorder %s389_s5, %s485_s2 }
  0xf7   :  { %p395_p1 = pnand %p393_p0, %p390_p13 }
  0xf9   :  { %398 = shalt.err (!%p395_p1)
}
  0xfa   :  { %317 = dma.vmem_to_hbm [thread:$0]  %s315_s29, 128, %s485_s2, [#allocation4]  }
  0xfb   :  { %401 = dma.done.wait [#allocation4], 128  }
  0xfc   :  { %402 = vsyncadd [#allocation4], 4294967168 }
  0xfd   :  { %321 = vsyncpa [#allocation3], 1 }
  0xfe   :  { %322 = vsyncpa [#allocation4], 1 }

</bundles_post_ra>
